<compile_context>
chip_gen: v6e
topology: v6e:2x2x1
jax: 0.10.0
libtpu: 0.0.40
codegen_flags: <defaults>
</compile_context>

<pallas_src>
import jax
import jax.numpy as jnp
from jax.experimental import pallas as pl
from jax.experimental.pallas import tpu as pltpu

_LANE = 128
_COL_CANDIDATES = (4096, 2048, 1024, 512, 256, 128)
_MIN_STEPS = 4   # minimum grid steps when possible (pipelining + v7x 2-TC balance)


def _relu_kernel(scale_ref, bias_ref, x_ref, res_ref, y_ref):
    # scale/bias live in SMEM as f32 scalars; compute in f32, cast on store.
    s = scale_ref[0]
    b = bias_ref[0]
    y = x_ref[...].astype(jnp.float32) * s + b + res_ref[...].astype(jnp.float32)
    y_ref[...] = jnp.maximum(y, 0.0).astype(y_ref.dtype)


def _sublane_multiple(dtype):
    # Native TPU sublane packing: 8 rows f32, 16 rows bf16, 32 rows int8/fp8.
    return max(8, 32 // jnp.dtype(dtype).itemsize)


def _vmem_budget():
    """Generation-aware (per-buffer block bytes, vmem_limit_bytes)."""
    try:
        vmem_bytes = int(pltpu.get_tpu_info().vmem_capacity_bytes)
    except Exception:
        vmem_bytes = 64 * 1024 * 1024  # be conservative if the query fails
    if vmem_bytes >= 96 * 1024 * 1024:
        # v5e / v6e: 128 MiB VMEM -> 10 MiB/buffer (3 arrays x 2 bufs = 60 MiB).
        return 10 * 1024 * 1024, 96 * 1024 * 1024
    # v7x: 64 MiB VMEM per TensorCore -> 5 MiB/buffer (30 MiB of pipeline
    # buffers); keep ~20 MiB headroom for Mosaic internal scratch.
    return 5 * 1024 * 1024, 44 * 1024 * 1024


def _pick_cols(n, sub):
    """Widest lane-dense width dividing n, preferring full sublane occupancy."""
    divisors = [c for c in _COL_CANDIDATES if n % c == 0]
    if not divisors:
        return None
    for c in divisors:            # widest first
        if n // c >= sub:         # keep at least one full sublane group of rows
            return c
    return divisors[-1]           # tiny input: take the narrowest divisor


def _choose_row_block(rows, cols, itemsize, sub, block_bytes):
    # Bandwidth-optimal block (amortizes the ~0.35 us per-grid-step overhead).
    rb = max(sub, (block_bytes // (cols * itemsize) // sub) * sub)

    # Guarantee >= _MIN_STEPS grid steps when rows allow it, so the auto
    # pipeline overlaps writeback / next-block reads and both v7x TCs get work.
    if rows >= _MIN_STEPS * sub:
        cap = max(sub, (pl.cdiv(rows, _MIN_STEPS) // sub) * sub)
        rb = min(rb, cap)

    if rb >= rows:
        return rows               # single full-extent block (tiny inputs only)

    # Prefer an even number of grid steps (v7x megacore balance).
    steps = pl.cdiv(rows, rb)
    if steps % 2 == 1:
        rb_even = max(sub, ((pl.cdiv(rows, steps + 1) + sub - 1) // sub) * sub)
        if rb_even < rows and pl.cdiv(rows, rb_even) % 2 == 0:
            rb = rb_even
    return rb


def _run_2d(x2, r2, scale32, bias32):
    """Run the elementwise kernel over a 2D lane-dense slab."""
    rows, cols = x2.shape
    dtype = x2.dtype
    itemsize = jnp.dtype(dtype).itemsize
    sub = _sublane_multiple(dtype)
    block_bytes, vmem_limit = _vmem_budget()

    row_block = _choose_row_block(rows, cols, itemsize, sub, block_bytes)
    grid = (pl.cdiv(rows, row_block),)   # partial last block is masked by Pallas

    numel = rows * cols
    cost = pl.CostEstimate(flops=3 * numel, transcendentals=0,
                           bytes_accessed=3 * numel * itemsize)

    # TODO(synk): on v7x, sweep pipeline_mode=pl.Buffered(3) on the x/res
    # in_specs if a trace still shows exposed DMA after the larger blocks.
    return pl.pallas_call(
        _relu_kernel,
        out_shape=jax.ShapeDtypeStruct((rows, cols), dtype),
        grid=grid,
        in_specs=[
            pl.BlockSpec(memory_space=pltpu.SMEM),                 # scale (f32)
            pl.BlockSpec(memory_space=pltpu.SMEM),                 # bias  (f32)
            pl.BlockSpec((row_block, cols), lambda i: (i, 0)),     # x tile
            pl.BlockSpec((row_block, cols), lambda i: (i, 0)),     # residual tile
        ],
        out_specs=pl.BlockSpec((row_block, cols), lambda i: (i, 0)),
        compiler_params=pltpu.CompilerParams(
            dimension_semantics=("parallel",),
            vmem_limit_bytes=vmem_limit,
        ),
        cost_estimate=cost,
    )(scale32, bias32, x2, r2)


def blocksparse_relu(x, scale, bias, residual):
    """y = relu(x * scale + bias + residual), elementwise; preserves shape/dtype."""
    assert x.shape == residual.shape, "x and residual must have the same shape"
    assert jnp.issubdtype(x.dtype, jnp.floating), (
        "only float dtypes are supported (integer .astype would wrap, not saturate)")
    orig_shape = x.shape
    n = x.size
    sub = _sublane_multiple(x.dtype)

    scale32 = jnp.asarray(scale, jnp.float32).reshape(1)
    bias32 = jnp.asarray(bias, jnp.float32).reshape(1)

    xf = x.reshape(-1)
    rf = residual.reshape(-1)

    # Fast path: lane-dense column count that divides n exactly (free reshape).
    cols = _pick_cols(n, sub)
    if cols is not None:
        y2 = _run_2d(xf.reshape(n // cols, cols),
                     rf.reshape(n // cols, cols), scale32, bias32)
        return y2.reshape(orig_shape)

    # n not a multiple of 128: fast path on the 128-aligned prefix, plus one
    # tiny padded (1, 128) call for the <=127-element tail.
    n_main = (n // _LANE) * _LANE
    pieces = []
    if n_main:
        cm = _pick_cols(n_main, sub)
        y_main = _run_2d(xf[:n_main].reshape(n_main // cm, cm),
                         rf[:n_main].reshape(n_main // cm, cm), scale32, bias32)
        pieces.append(y_main.reshape(-1))
    n_tail = n - n_main
    if n_tail:
        pad = _LANE - n_tail
        xt = jnp.pad(xf[n_main:], (0, pad)).reshape(1, _LANE)
        rt = jnp.pad(rf[n_main:], (0, pad)).reshape(1, _LANE)
        y_tail = _run_2d(xt, rt, scale32, bias32)
        pieces.append(y_tail.reshape(-1)[:n_tail])
    y = pieces[0] if len(pieces) == 1 else jnp.concatenate(pieces)
    return y.reshape(orig_shape)


if __name__ == "__main__":
    key = jax.random.PRNGKey(0)
    k1, k2, k3, k4, k5, k6 = jax.random.split(key, 6)

    scale = jnp.float32(1.5)
    bias = jnp.float32(-0.25)

    def ref_fn(xa, ra):
        xf = xa.astype(jnp.float32)
        rf = ra.astype(jnp.float32)
        return jnp.maximum(xf * 1.5 + (-0.25) + rf, 0.0).astype(xa.dtype)

    # 1) small NCHW f32 (n = 2048 -> sublane-dense (8, 256) single block)
    x1 = jax.random.normal(k1, (2, 4, 16, 16), dtype=jnp.float32)
    r1 = jax.random.normal(k2, (2, 4, 16, 16), dtype=jnp.float32)
    y1 = jax.block_until_ready(blocksparse_relu(x1, scale, bias, r1))
    assert y1.shape == x1.shape and y1.dtype == x1.dtype
    assert jnp.allclose(y1, ref_fn(x1, r1), atol=1e-6, rtol=1e-6)

    # 2) larger f32: cols=1024, rows=1111 -> even multi-step grid, masked last block
    x2 = jax.random.normal(k3, (11, 101, 32, 32), dtype=jnp.float32)
    r2 = jax.random.normal(k4, (11, 101, 32, 32), dtype=jnp.float32)
    y2 = jax.block_until_ready(blocksparse_relu(x2, scale, bias, r2))
    assert jnp.allclose(y2, ref_fn(x2, r2), atol=1e-6, rtol=1e-6)

    # 3) n = 210 (not a multiple of 128) -> aligned-prefix + tiny-tail fallback
    x3 = jax.random.normal(k5, (2, 3, 5, 7), dtype=jnp.float32)
    r3 = jax.random.normal(k6, (2, 3, 5, 7), dtype=jnp.float32)
    y3 = jax.block_until_ready(blocksparse_relu(x3, scale, bias, r3))
    assert jnp.allclose(y3, ref_fn(x3, r3), atol=1e-6, rtol=1e-6)

    # 4) bf16 input: dtype-aware sublane handling, multi-step grid, masked tail rows
    xb = jax.random.normal(k1, (2, 3, 33, 64), dtype=jnp.float32).astype(jnp.bfloat16)
    rb = jax.random.normal(k2, (2, 3, 33, 64), dtype=jnp.float32).astype(jnp.bfloat16)
    yb = jax.block_until_ready(blocksparse_relu(xb, scale, bias, rb))
    assert yb.shape == xb.shape and yb.dtype == jnp.bfloat16
    assert jnp.allclose(yb.astype(jnp.float32), ref_fn(xb, rb).astype(jnp.float32),
                        atol=2e-2, rtol=2e-2)

    print("KERNEL_OK")
</pallas_src>

<mosaic_0001>
module attributes {stable_mosaic.version = 11 : i64} {
  func.func @_relu_kernel(%arg0: i32, %arg1: memref<1xf32, #tpu.memory_space<smem>>, %arg2: memref<1xf32, #tpu.memory_space<smem>>, %arg3: memref<8x256xf32, #tpu.memory_space<vmem>>, %arg4: memref<8x256xf32, #tpu.memory_space<vmem>>, %arg5: memref<8x256xf32, #tpu.memory_space<vmem>>) attributes {dimension_semantics = [#tpu.dimension_semantics<parallel>], iteration_bounds = array<i64: 1>, scalar_prefetch = 0 : i64, scratch_operands = 0 : i64, tpu.core_type = #tpu.core_type<tc>, window_params = [{transform_indices = @transform_0, window_bounds = array<i64: 1>}, {transform_indices = @transform_1, window_bounds = array<i64: 1>}, {transform_indices = @transform_2, window_bounds = array<i64: 8, 256>}, {transform_indices = @transform_3, window_bounds = array<i64: 8, 256>}, {transform_indices = @transform_4, window_bounds = array<i64: 8, 256>}]} {
    %c0 = arith.constant 0 : index
    %0 = memref.load %arg1[%c0] : memref<1xf32, #tpu.memory_space<smem>>
    %c0_0 = arith.constant 0 : index
    %1 = memref.load %arg2[%c0_0] : memref<1xf32, #tpu.memory_space<smem>>
    %c0_1 = arith.constant 0 : index
    %c0_2 = arith.constant 0 : index
    %2 = vector.load %arg3[%c0_1, %c0_2] : memref<8x256xf32, #tpu.memory_space<vmem>>, vector<8x256xf32>
    %3 = vector.broadcast %0 : f32 to vector<8x256xf32>
    %4 = arith.mulf %2, %3 : vector<8x256xf32>
    %5 = vector.broadcast %1 : f32 to vector<8x256xf32>
    %6 = arith.addf %4, %5 : vector<8x256xf32>
    %c0_3 = arith.constant 0 : index
    %c0_4 = arith.constant 0 : index
    %7 = vector.load %arg4[%c0_3, %c0_4] : memref<8x256xf32, #tpu.memory_space<vmem>>, vector<8x256xf32>
    %8 = arith.addf %6, %7 : vector<8x256xf32>
    %cst = arith.constant 0.000000e+00 : f32
    %9 = vector.broadcast %cst : f32 to vector<8x256xf32>
    %10 = arith.maximumf %8, %9 : vector<8x256xf32>
    %c0_5 = arith.constant 0 : index
    %c0_6 = arith.constant 0 : index
    %11 = vector.load %arg5[%c0_5, %c0_6] : memref<8x256xf32, #tpu.memory_space<vmem>>, vector<8x256xf32>
    tpu.vector_store %arg5[%c0_5, %c0_6], %10 {strides = array<i32>} : memref<8x256xf32, #tpu.memory_space<vmem>>, vector<8x256xf32>,
    return
  }
  func.func @transform_0(%arg0: i32) -> i32 {
    %c0_i32 = arith.constant 0 : i32
    %c0_i32_0 = arith.constant 0 : i32
    return %c0_i32 : i32
  }
  func.func @transform_1(%arg0: i32) -> i32 {
    %c0_i32 = arith.constant 0 : i32
    %c0_i32_0 = arith.constant 0 : i32
    return %c0_i32 : i32
  }
  func.func @transform_2(%arg0: i32) -> (i32, i32) {
    %c0_i32 = arith.constant 0 : i32
    %c0_i32_0 = arith.constant 0 : i32
    return %arg0, %c0_i32 : i32, i32
  }
  func.func @transform_3(%arg0: i32) -> (i32, i32) {
    %c0_i32 = arith.constant 0 : i32
    %c0_i32_0 = arith.constant 0 : i32
    return %arg0, %c0_i32 : i32, i32
  }
  func.func @transform_4(%arg0: i32) -> (i32, i32) {
    %c0_i32 = arith.constant 0 : i32
    %c0_i32_0 = arith.constant 0 : i32
    return %arg0, %c0_i32 : i32, i32
  }
}

</mosaic_0001>

<bundles_post_ra>
// kernel: tpu_custom_call.1
= control target key start
LH: loop header
LB: loop body
LE: loop exit
PB: predicated region body
PF: predicated region fallthrough
CT: control target
= control target key end

     0   :  { %11 = vsyncpa [#allocation5], 0  ;;  %s190_s0 = inlined_call_operand.<no memory space> [shape: f32[1], index: 0, kind: input, shape index: {}]   ;;  %s191_s1 = inlined_call_operand.<no memory space> [shape: f32[1], index: 1, kind: input, shape index: {}]   ;;  %s192_s2 = inlined_call_operand.hbm [shape: f32[8,256], index: 2, kind: input, shape index: {}]   ;;  %s193_s3 = inlined_call_operand.hbm [shape: f32[8,256], index: 3, kind: input, shape index: {}]   ;;  %s194_s4 = inlined_call_operand.hbm [shape: f32[8,256], index: 4, kind: output, shape index: {}]  }
   0x1   :  { %12 = vsyncpa [#allocation8], 0 }
   0x2   :  { %13 = vsyncpa [#allocation6], 0  ;;  %s147_s15 = smov [#allocation4]   ;;  %s148_s17 = smov [#allocation7]  }
   0x3   :  { %s24_s16 = sshll.u32 %s147_s15, 4  ;;  %s34_s18 = sshll.u32 %s148_s17, 4  ;;  %s25_s16 = int_to_ptr.vmem [resolvable:$true] %s24_s16  ;;  %s35_s18 = int_to_ptr.vmem [resolvable:$true] %s34_s18 }
   0x4   :  { %s89_s19 = scalar_lea.vmem %s25_s16, 256  ;;  %p94_p1 = scmp.lt.s32.totalorder %s25_s16, %s25_s16 }
   0x5   :  { %p90_p0 = scmp.ne.s32.totalorder %s25_s16, %s89_s19  ;;  %p95_p2 = scmp.lt.s32.totalorder %s89_s19, %s89_s19 }
   0x7   :  { %p96_p3 = por %p95_p2, %p94_p1 }
   0x9   :  { %p97_p4 = pnand %p96_p3, %p90_p0 }
   0xb   :  { %100 = shalt.err (!%p97_p4)
}
   0xc   :  { %27 = dma.hbm_to_vmem [thread:$0]  %s192_s2, 256, %s25_s16, [#allocation5]  }
   0xd   :  { %s109_s22 = scalar_lea.vmem %s35_s18, 256  ;;  %p114_p6 = scmp.lt.s32.totalorder %s35_s18, %s35_s18 }
   0xe   :  { %p110_p5 = scmp.ne.s32.totalorder %s35_s18, %s109_s22  ;;  %p115_p7 = scmp.lt.s32.totalorder %s109_s22, %s109_s22 }
  0x10   :  { %p116_p8 = por %p115_p7, %p114_p6 }
  0x12   :  { %p117_p9 = pnand %p116_p8, %p110_p5 }
  0x14   :  { %120 = shalt.err (!%p117_p9)
}
  0x15   :  { %37 = dma.hbm_to_vmem [thread:$0]  %s193_s3, 256, %s35_s18, [#allocation8]  }
  0x16   :  { %141 = dma.done.wait [#allocation5], 256  }
  0x17   :  { %142 = vsyncadd [#allocation5], 4294967040 }
  0x18   :  { %143 = dma.done.wait [#allocation8], 256  }
  0x19   :  { %144 = vsyncadd [#allocation8], 4294967040  ;;  %v48_v0 = vstv %s190_s0  ;;  %v46_v1 = vld [vmem:[#allocation4] sm:$0xff]  ;;  %v51_v2 = vstv %s191_s1  ;;  %v47_v3 = vld [vmem:[#allocation4 + $0x8] sm:$0xff]  ;;  %s149_s3 = smov [#allocation9]  }
  0x1a   :  { %v49_v4 = vmul.f32 %v48_v0, %v46_v1  ;;  %v50_v5 = vmul.f32 %v48_v0, %v47_v3  ;;  %v54_v6 = vld [vmem:[#allocation7] sm:$0xff]  ;;  %v55_v7 = vld [vmem:[#allocation7 + $0x8] sm:$0xff]  ;;  %s68_s28 = sshll.u32 %s149_s3, 4  ;;  %s69_s28 = int_to_ptr.vmem [resolvable:$true] %s68_s28 }
  0x1b   :  { %s121_s0 = scalar_lea.vmem %s69_s28, 256  ;;  %p126_p11 = scmp.lt.s32.totalorder %s69_s28, %s69_s28 }
  0x1c   :  { %v52_v8 = vadd.f32 %v51_v2, %v49_v4  ;;  %v53_v9 = vadd.f32 %v51_v2, %v50_v5  ;;  %p122_p10 = scmp.ne.s32.totalorder %s69_s28, %s121_s0  ;;  %p127_p12 = scmp.lt.s32.totalorder %s121_s0, %s121_s0 }
  0x1e   :  { %v56_v10 = vadd.f32 %v54_v6, %v52_v8  ;;  %v57_v11 = vadd.f32 %v55_v7, %v53_v9  ;;  %p128_p13 = por %p127_p12, %p126_p11 }
  0x20   :  { %v58_v12 = vmax.f32 %v56_v10, 0.0  ;;  %v59_v13 = vmax.f32 %v57_v11, 0.0  ;;  %p129_p0 = pnand %p128_p13, %p122_p10 }
  0x22   :  { %60 = vst [vmem:[#allocation9] sm:$0xff] %v58_v12  ;;  %61 = vst [vmem:[#allocation9 + $0x8] sm:$0xff] %v59_v13 }
  0x23   :  { %132 = shalt.err (!%p129_p0)
}
  0x24   :  { %71 = dma.vmem_to_hbm [thread:$0]  %s69_s28, 256, %s194_s4, [#allocation6]  }
  0x25   :  { %145 = dma.done.wait [#allocation6], 256  }
  0x26   :  { %146 = vsyncadd [#allocation6], 4294967040 }
  0x27   :  { %75 = vsyncpa [#allocation5], 1 }
  0x28   :  { %76 = vsyncpa [#allocation8], 1 }
  0x29   :  { %77 = vsyncpa [#allocation6], 1 }

</bundles_post_ra>
